<compile_context>
chip_gen: v5e
topology: v5e:2x2
jax: 0.10.0
libtpu: 0.0.40
codegen_flags: <defaults>
</compile_context>

<pallas_src>
import math
import functools

import jax
import jax.numpy as jnp
from jax.experimental import pallas as pl
from jax.experimental.pallas import tpu as pltpu


# ------------------------------ tile helper -------------------------------- #
def _pick_tile(dim, preferred, align):
    """Largest tile <= preferred that divides dim and is a multiple of align; else full dim."""
    if dim <= preferred:
        return dim
    t = (preferred // align) * align
    while t >= align:
        if dim % t == 0:
            return t
        t -= align
    return dim


# ----------------------------- Tiled linear -------------------------------- #
def _linear_kernel(x_ref, w_ref, b_ref, o_ref, acc_ref):
    # x: (tm, tk), w: (tk, tn) [pre-transposed to (in, out)], b: (1, tn) -> o: (tm, tn)
    @pl.when(pl.program_id(2) == 0)
    def _():
        acc_ref[...] = jnp.zeros_like(acc_ref)

    acc_ref[...] += jnp.dot(x_ref[...], w_ref[...], preferred_element_type=jnp.float32)

    @pl.when(pl.program_id(2) == pl.num_programs(2) - 1)
    def _():
        o_ref[...] = (acc_ref[...] + b_ref[...]).astype(o_ref.dtype)


def linear(x, wt, b, *, tm=256, tn=256, tk=512):
    """y = x @ wt + b, with wt already transposed to (K, N) (i.e. PyTorch weight.T)."""
    M, K = x.shape
    K2, N = wt.shape
    assert K == K2
    tm = _pick_tile(M, tm, 8)
    tn = _pick_tile(N, tn, 128)
    tk = _pick_tile(K, tk, 128)
    grid = (M // tm, N // tn, K // tk)
    cost = pl.CostEstimate(
        flops=2 * M * N * K,
        transcendentals=0,
        bytes_accessed=4 * (M * K + K * N + M * N + N),
    )
    return pl.pallas_call(
        _linear_kernel,
        out_shape=jax.ShapeDtypeStruct((M, N), jnp.float32),
        grid=grid,
        in_specs=[
            pl.BlockSpec((tm, tk), lambda i, j, k: (i, k)),
            pl.BlockSpec((tk, tn), lambda i, j, k: (k, j)),
            pl.BlockSpec((1, tn), lambda i, j, k: (0, j)),
        ],
        out_specs=pl.BlockSpec((tm, tn), lambda i, j, k: (i, j)),
        scratch_shapes=[pltpu.VMEM((tm, tn), jnp.float32)],
        compiler_params=pltpu.CompilerParams(
            dimension_semantics=("parallel", "parallel", "arbitrary")),
        cost_estimate=cost,
    )(x, wt, b.reshape(1, N))


# ----------------------- Flash-style MQA attention ------------------------- #
def _mqa_flash_kernel(q_ref, k_ref, v_ref, mask_ref, o_ref,
                      m_sc, l_sc, acc_sc, *, mask_value):
    ki = pl.program_id(3)

    @pl.when(ki == 0)
    def _():
        m_sc[...] = jnp.full_like(m_sc, -jnp.inf)
        l_sc[...] = jnp.zeros_like(l_sc)
        acc_sc[...] = jnp.zeros_like(acc_sc)

    q = q_ref[0, 0, :, :]          # (tq, Dh)  (softmax scale pre-folded into q projection)
    k = k_ref[0, :, :]             # (tkv, Dh)
    v = v_ref[0, :, :]             # (tkv, Dh)
    keep = mask_ref[0, :, :] > 0   # (tq, tkv)

    # scores = q @ k^T : contract over head_dim without an explicit transpose op.
    s = jax.lax.dot_general(q, k, (((1,), (1,)), ((), ())),
                            preferred_element_type=jnp.float32)
    s = jnp.where(keep, s, mask_value)

    m_prev = m_sc[...]                                        # (tq, 1)
    m_new = jnp.maximum(m_prev, jnp.max(s, axis=-1, keepdims=True))
    alpha = jnp.exp(m_prev - m_new)
    p = jnp.exp(s - m_new)                                    # (tq, tkv)
    l_sc[...] = alpha * l_sc[...] + jnp.sum(p, axis=-1, keepdims=True)
    acc_sc[...] = alpha * acc_sc[...] + jnp.dot(p, v, preferred_element_type=jnp.float32)
    m_sc[...] = m_new

    @pl.when(ki == pl.num_programs(3) - 1)
    def _():
        inv_l = pl.reciprocal(l_sc[...], approx=True)         # EUP vrcp
        o_ref[0, 0, :, :] = (acc_sc[...] * inv_l).astype(o_ref.dtype)


def mqa_flash_attention(q_h, k, v, mask_i8, *, tq=256, tkv=512):
    """q_h: (B, H, S, Dh), k/v: (B, K, Dh), mask_i8: (B, S, K) int8 (1 = attend)."""
    B, H, S, Dh = q_h.shape
    Klen = k.shape[1]
    tq = _pick_tile(S, tq, 32)       # 32-aligned keeps the int8 mask block tiling legal
    tkv = _pick_tile(Klen, tkv, 128)
    n_q, n_k = S // tq, Klen // tkv
    mask_value = float(jnp.finfo(jnp.float32).min)
    kernel = functools.partial(_mqa_flash_kernel, mask_value=mask_value)
    cost = pl.CostEstimate(
        flops=4 * B * H * S * Klen * Dh,
        transcendentals=B * H * S * Klen,
        bytes_accessed=4 * (2 * B * H * S * Dh + 2 * B * H * n_q * Klen * Dh)
                       + B * H * S * Klen,
    )
    return pl.pallas_call(
        kernel,
        out_shape=jax.ShapeDtypeStruct((B, H, S, Dh), jnp.float32),
        grid=(B, H, n_q, n_k),
        in_specs=[
            pl.BlockSpec((1, 1, tq, Dh), lambda b, h, qi, ki: (b, h, qi, 0)),
            pl.BlockSpec((1, tkv, Dh), lambda b, h, qi, ki: (b, ki, 0)),
            pl.BlockSpec((1, tkv, Dh), lambda b, h, qi, ki: (b, ki, 0)),
            pl.BlockSpec((1, tq, tkv), lambda b, h, qi, ki: (b, qi, ki)),
        ],
        out_specs=pl.BlockSpec((1, 1, tq, Dh), lambda b, h, qi, ki: (b, h, qi, 0)),
        scratch_shapes=[
            pltpu.VMEM((tq, 1), jnp.float32),    # running max  m
            pltpu.VMEM((tq, 1), jnp.float32),    # running sum  l
            pltpu.VMEM((tq, Dh), jnp.float32),   # output accumulator
        ],
        compiler_params=pltpu.CompilerParams(
            dimension_semantics=("parallel", "parallel", "parallel", "arbitrary")),
        cost_estimate=cost,
    )(q_h, k, v, mask_i8)


# ------------------------------ Full forward ------------------------------- #
def gpt_bigcode_attention_forward(hidden_states, params, attention_mask, num_heads):
    """Equivalent of GPTBigCodeAttention.forward (multi_query path, no cache).

    hidden_states: (B, S, E) float32
    attention_mask: (B, S, 1, K) bool (True = attend)
    returns attn_output: (B, S, E)
    """
    B, S, E = hidden_states.shape
    H = num_heads
    Dh = E // H
    Klen = S
    scale = 1.0 / math.sqrt(Dh)   # unscale == 1 for fp32 activations

    x = hidden_states.reshape(B * S, E)

    # Fused q_attn + kv_attn projection; fold the softmax scale into the q slice (free).
    w_fused = jnp.concatenate([params["q_w"] * scale, params["kv_w"]], axis=0)  # (E+2Dh, E)
    b_fused = jnp.concatenate([params["q_b"] * scale, params["kv_b"]], axis=0)  # (E+2Dh,)
    wt_fused = jnp.transpose(w_fused)                                           # (E, E+2Dh)

    qkv = linear(x, wt_fused, b_fused)                 # (B*S, E + 2*Dh)
    q = qkv[:, :E]
    key = qkv[:, E:E + Dh].reshape(B, Klen, Dh)
    value = qkv[:, E + Dh:].reshape(B, Klen, Dh)

    # Head-major query layout (B, H, S, Dh): each grid step works on a clean 2D (tq, Dh) tile.
    q_h = q.reshape(B, S, H, Dh).transpose(0, 2, 1, 3)

    # Compact int8 mask (B, S, K); never H-expanded in HBM.
    mask_i8 = attention_mask[:, :, 0, :].astype(jnp.int8)

    attn = mqa_flash_attention(q_h, key, value, mask_i8)   # (B, H, S, Dh)
    attn = attn.transpose(0, 2, 1, 3).reshape(B * S, E)

    # attn_output = self.c_proj(attn_output)
    out = linear(attn, jnp.transpose(params["proj_w"]), params["proj_b"])
    return out.reshape(B, S, E)


# ----------------------------- JAX reference ------------------------------- #
def reference_forward(hidden_states, params, attention_mask, num_heads):
    B, S, E = hidden_states.shape
    H = num_heads
    Dh = E // H
    x = hidden_states.reshape(B * S, E)
    q = x @ params["q_w"].T + params["q_b"]
    kv = x @ params["kv_w"].T + params["kv_b"]
    key = kv[:, :Dh].reshape(B, S, Dh)
    value = kv[:, Dh:].reshape(B, S, Dh)
    q = q.reshape(B, S * H, Dh)
    scores = jnp.einsum("bqd,bkd->bqk", q, key) / math.sqrt(Dh)
    scores = scores.reshape(B, S, H, S)
    scores = jnp.where(attention_mask, scores, jnp.finfo(jnp.float32).min)
    probs = jax.nn.softmax(scores, axis=-1).reshape(B, S * H, S)
    attn = jnp.einsum("bqk,bkd->bqd", probs, value).reshape(B * S, E)
    out = attn @ params["proj_w"].T + params["proj_b"]
    return out.reshape(B, S, E)


# --------------------------------- Main ------------------------------------ #
if __name__ == "__main__":
    B, S, E, H = 2, 8, 32, 4
    Dh = E // H
    kv_dim = Dh  # multi_query -> 1 kv head

    key0 = jax.random.PRNGKey(0)
    ks = jax.random.split(key0, 8)
    init = lambda k, shape, scale=0.05: (scale * jax.random.normal(k, shape)).astype(jnp.float32)

    params = {
        "q_w": init(ks[0], (E, E)),
        "q_b": init(ks[1], (E,)),
        "kv_w": init(ks[2], (2 * kv_dim, E)),
        "kv_b": init(ks[3], (2 * kv_dim,)),
        "proj_w": init(ks[4], (E, E)),
        "proj_b": init(ks[5], (E,)),
    }

    hidden_states = init(ks[6], (B, S, E), scale=1.0)

    # causal attention mask, shape (B, S, 1, K), True = attend
    causal = jnp.tril(jnp.ones((S, S), dtype=bool))
    attention_mask = jnp.broadcast_to(causal[None, :, None, :], (B, S, 1, S))

    out = gpt_bigcode_attention_forward(hidden_states, params, attention_mask, H)
    out = jax.block_until_ready(out)

    ref = reference_forward(hidden_states, params, attention_mask, H)
    assert out.shape == (B, S, E)
    # tolerance slightly relaxed vs the exact-divide version: softmax denominator uses the
    # EUP approximate reciprocal (pl.reciprocal(approx=True)).
    assert jnp.allclose(out, ref, atol=2e-3, rtol=2e-3), "mismatch vs JAX reference"

    print("KERNEL_OK")
</pallas_src>

<mosaic_0001>
module attributes {stable_mosaic.version = 11 : i64} {
  func.func @_linear_kernel(%arg0: i32, %arg1: i32, %arg2: i32, %arg3: memref<16x32xf32, #tpu.memory_space<vmem>>, %arg4: memref<32x48xf32, #tpu.memory_space<vmem>>, %arg5: memref<1x48xf32, #tpu.memory_space<vmem>>, %arg6: memref<16x48xf32, #tpu.memory_space<vmem>>, %arg7: memref<16x48xf32, #tpu.memory_space<vmem>>) attributes {dimension_semantics = [#tpu.dimension_semantics<parallel>, #tpu.dimension_semantics<parallel>, #tpu.dimension_semantics<arbitrary>], iteration_bounds = array<i64: 1, 1, 1>, scalar_prefetch = 0 : i64, scratch_operands = 1 : i64, tpu.core_type = #tpu.core_type<tc>, window_params = [{transform_indices = @transform_0, window_bounds = array<i64: 16, 32>}, {transform_indices = @transform_1, window_bounds = array<i64: 32, 48>}, {transform_indices = @transform_2, window_bounds = array<i64: 1, 48>}, {transform_indices = @transform_3, window_bounds = array<i64: 16, 48>}]} {
    %c0_i32 = arith.constant 0 : i32
    %0 = arith.cmpi eq, %arg2, %c0_i32 : i32
    %1 = arith.extui %0 : i1 to i32
    %c0_i32_0 = arith.constant 0 : i32
    %2 = arith.cmpi ne, %1, %c0_i32_0 : i32
    scf.if %2 {
      %cst_10 = arith.constant 0.000000e+00 : f32
      %12 = vector.broadcast %cst_10 : f32 to vector<16x48xf32>
      %c0_11 = arith.constant 0 : index
      %c0_12 = arith.constant 0 : index
      %13 = vector.load %arg7[%c0_11, %c0_12] : memref<16x48xf32, #tpu.memory_space<vmem>>, vector<16x48xf32>
      tpu.vector_store %arg7[%c0_11, %c0_12], %12 {strides = array<i32>} : memref<16x48xf32, #tpu.memory_space<vmem>>, vector<16x48xf32>,
    } else {
    }
    %c0 = arith.constant 0 : index
    %c0_1 = arith.constant 0 : index
    %3 = vector.load %arg7[%c0, %c0_1] : memref<16x48xf32, #tpu.memory_space<vmem>>, vector<16x48xf32>
    %c0_2 = arith.constant 0 : index
    %c0_3 = arith.constant 0 : index
    %4 = vector.load %arg3[%c0_2, %c0_3] : memref<16x32xf32, #tpu.memory_space<vmem>>, vector<16x32xf32>
    %c0_4 = arith.constant 0 : index
    %c0_5 = arith.constant 0 : index
    %5 = vector.load %arg4[%c0_4, %c0_5] : memref<32x48xf32, #tpu.memory_space<vmem>>, vector<32x48xf32>
    %cst = arith.constant dense<0.000000e+00> : vector<16x48xf32>
    %6 = tpu.matmul %4, %5, %cst {dimension_numbers = #tpu.dot_dimension_numbers<[1], [0], [0], [1], [0, 0, 1, 1], [], []>} : vector<16x32xf32>, vector<32x48xf32>, vector<16x48xf32> -> vector<16x48xf32>
    %7 = arith.addf %3, %6 : vector<16x48xf32>
    %c0_6 = arith.constant 0 : index
    %c0_7 = arith.constant 0 : index
    %8 = vector.load %arg7[%c0_6, %c0_7] : memref<16x48xf32, #tpu.memory_space<vmem>>, vector<16x48xf32>
    tpu.vector_store %arg7[%c0_6, %c0_7], %7 {strides = array<i32>} : memref<16x48xf32, #tpu.memory_space<vmem>>, vector<16x48xf32>,
    %c0_i32_8 = arith.constant 0 : i32
    %9 = arith.cmpi eq, %arg2, %c0_i32_8 : i32
    %10 = arith.extui %9 : i1 to i32
    %c0_i32_9 = arith.constant 0 : i32
    %11 = arith.cmpi ne, %10, %c0_i32_9 : i32
    scf.if %11 {
      %c0_10 = arith.constant 0 : index
      %c0_11 = arith.constant 0 : index
      %12 = vector.load %arg7[%c0_10, %c0_11] : memref<16x48xf32, #tpu.memory_space<vmem>>, vector<16x48xf32>
      %c0_12 = arith.constant 0 : index
      %c0_13 = arith.constant 0 : index
      %13 = vector.load %arg5[%c0_12, %c0_13] : memref<1x48xf32, #tpu.memory_space<vmem>>, vector<1x48xf32>
      %14 = vector.broadcast %13 : vector<1x48xf32> to vector<16x48xf32>
      %15 = arith.addf %12, %14 : vector<16x48xf32>
      %c0_14 = arith.constant 0 : index
      %c0_15 = arith.constant 0 : index
      %16 = vector.load %arg6[%c0_14, %c0_15] : memref<16x48xf32, #tpu.memory_space<vmem>>, vector<16x48xf32>
      tpu.vector_store %arg6[%c0_14, %c0_15], %15 {strides = array<i32>} : memref<16x48xf32, #tpu.memory_space<vmem>>, vector<16x48xf32>,
    } else {
    }
    return
  }
  func.func @transform_0(%arg0: i32, %arg1: i32, %arg2: i32) -> (i32, i32) {
    %c0_i32 = arith.constant 0 : i32
    return %arg0, %arg2 : i32, i32
  }
  func.func @transform_1(%arg0: i32, %arg1: i32, %arg2: i32) -> (i32, i32) {
    %c0_i32 = arith.constant 0 : i32
    return %arg2, %arg1 : i32, i32
  }
  func.func @transform_2(%arg0: i32, %arg1: i32, %arg2: i32) -> (i32, i32) {
    %c0_i32 = arith.constant 0 : i32
    %c0_i32_0 = arith.constant 0 : i32
    return %c0_i32, %arg1 : i32, i32
  }
  func.func @transform_3(%arg0: i32, %arg1: i32, %arg2: i32) -> (i32, i32) {
    %c0_i32 = arith.constant 0 : i32
    return %arg0, %arg1 : i32, i32
  }
}

</mosaic_0001>

<bundles_post_ra>
// kernel: tpu_custom_call.1
= control target key start
LH: loop header
LB: loop body
LE: loop exit
PB: predicated region body
PF: predicated region fallthrough
CT: control target
= control target key end

     0   :  { %8 = vsyncpa [#allocation4], 0  ;;  %s274_s0 = inlined_call_operand.hbm [shape: f32[16,32], index: 0, kind: input, shape index: {}]   ;;  %s275_s1 = inlined_call_operand.hbm [shape: f32[32,48], index: 1, kind: input, shape index: {}]   ;;  %s276_s2 = inlined_call_operand.vmem [shape: f32[1,48], index: 2, kind: input, shape index: {}]   ;;  %s277_s3 = inlined_call_operand.hbm [shape: f32[16,48], index: 3, kind: output, shape index: {}]  }
   0x1   :  { %9 = vsyncpa [#allocation7], 0 }
   0x2   :  { %10 = vsyncpa [#allocation5], 0  ;;  %s15_s14 = sshll.u32 %s274_s0, 4  ;;  %s221_s15 = smov [#allocation3]   ;;  %s16_s14 = int_to_ptr.hbm [resolvable:$true] %s15_s14 }
   0x3   :  { %s17_s16 = sshll.u32 %s221_s15, 4  ;;  %s28_s19 = sshll.u32 %s275_s1, 4  ;;  %s18_s16 = int_to_ptr.vmem [resolvable:$true] %s17_s16  ;;  %s29_s19 = int_to_ptr.hbm [resolvable:$true] %s28_s19 }
   0x4   :  { %s222_s20 = smov 128   ;;  %s223_s21 = smov 8  }
   0x5   :  { %23 = dma.hbm_to_vmem [thread:$0]  %s16_s14, 256, %s18_s16, [#allocation4], %s222_s20, %s222_s20, %s223_s21  }
   0x6   :  { %s224_s22 = smov [#allocation6]  }
   0x7   :  { %s30_s23 = sshll.u32 %s224_s22, 4  ;;  %s31_s23 = int_to_ptr.vmem [resolvable:$true] %s30_s23 }
   0x8   :  { %36 = dma.hbm_to_vmem [thread:$0]  %s29_s19, 512, %s31_s23, [#allocation7], %s222_s20, %s222_s20, %s223_s21  }
   0x9   :  { %215 = dma.done.wait [#allocation4], 256  }
   0xa   :  { %216 = vsyncadd [#allocation4], 4294967040 }
   0xb   :  { %217 = dma.done.wait [#allocation7], 512  }
   0xc   :  { %218 = vsyncadd [#allocation7], 4294966784  ;;  %vm51_vm0 = vcmask 392192   ;;  %v225_v0 = vmov 0.0   ;;  %v61_v1 = vld [vmem:[#allocation6 + $0x18] sm:$0xff]  ;;  %v60_v2 = vld [vmem:[#allocation6 + $0x10] sm:$0xff] }
   0xd   :  { %52 = vst.msk [vmem:[#allocation2] sm:$0xff] %vm51_vm0, %v225_v0  ;;  %81 = vmatpush.msra.mxu0 %v61_v1  ;;  %132 = vmatpush.msra.mxu1 %v61_v1  ;;  %v59_v3 = vld [vmem:[#allocation6 + $0x8] sm:$0xff]  ;;  %v58_v4 = vld [vmem:[#allocation6] sm:$0xff]  ;;  %v56_v5 = vld [vmem:[#allocation3] sm:$0xff]  ;;  %vm62_vm1 = vcmask 261120   ;;  %s226_s24 = smov [#allocation8]  }
   0xe   :  { %53 = vst.msk [vmem:[#allocation2 + $0x8] sm:$0xff] %vm51_vm0, %v225_v0  ;;  %v57_v6 = vld [vmem:[#allocation3 + $0x8] sm:$0xff]  ;;  %v142_v13 = vld [vmem:[%s276_s2] ss:$0 sm:$0xff]  ;;  %s114_s25 = sshll.u32 %s226_s24, 4  ;;  %s116_s28 = sshll.u32 %s277_s3, 4  ;;  %s115_s25 = int_to_ptr.vmem [resolvable:$true] %s114_s25  ;;  %s117_s28 = int_to_ptr.hbm [resolvable:$true] %s116_s28 }
   0xf   :  { %82 = vmatpush.msra.mxu0 %v60_v2  ;;  %133 = vmatpush.msra.mxu1 %v60_v2 }
  0x11   :  { %83 = vmatpush.msra.mxu0 %v59_v3  ;;  %134 = vmatpush.msra.mxu1 %v59_v3 }
  0x13   :  { %84 = vmatpush.msra.mxu0 %v58_v4  ;;  %135 = vmatpush.msra.mxu1 %v58_v4 }
  0x14   :  { %130 = vmatmul.msk.f32.vlgmr.msra.gmra.mxu0 %vm62_vm1, %v56_v5  ;;  %131 = vmatmul.msk.f32.vlgmr.msra.gmra.mxu1 %vm62_vm1, %v57_v6  ;;  %v54_v7 = vld [vmem:[#allocation2] sm:$0xff] }
  0x15   :  { %v55_v8 = vld [vmem:[#allocation2 + $0x8] sm:$0xff] }
  0x91   :  { %v86_v9 = vpop.f32.mrf.mxu0  ;;  %v89_v10 = vpop.f32.mrf.mxu1 }
  0x92   :  { %v92_v11 = vadd.f32 %v86_v9, %v54_v7  ;;  %v93_v12 = vadd.f32 %v89_v10, %v55_v8 }
  0x94   :  { %95 = vst.msk [vmem:[#allocation2] sm:$0xff] %vm51_vm0, %v92_v11 }
  0x95   :  { %96 = vst.msk [vmem:[#allocation2 + $0x8] sm:$0xff] %vm51_vm0, %v93_v12 }
  0x9b   :  { %v100_v14 = vld [vmem:[#allocation2] sm:$0xff] }
  0x9c   :  { %v101_v15 = vld [vmem:[#allocation2 + $0x8] sm:$0xff]  ;;  %v106_v16 = vadd.f32 %v142_v13, %v100_v14 }
  0x9d   :  { %v107_v17 = vadd.f32 %v142_v13, %v101_v15 }
  0x9e   :  { %108 = vst.msk [vmem:[#allocation8] sm:$0xff] %vm51_vm0, %v106_v16 }
  0x9f   :  { %109 = vst.msk [vmem:[#allocation8 + $0x8] sm:$0xff] %vm51_vm0, %v107_v17 }
  0xa0   :  { %122 = dma.vmem_to_hbm [thread:$0]  %s115_s25, 256, %s117_s28, [#allocation5], %s222_s20, %s222_s20, %s223_s21  }
  0xa1   :  { %219 = dma.done.wait [#allocation5], 256  }
  0xa2   :  { %220 = vsyncadd [#allocation5], 4294967040 }
  0xa3   :  { %127 = vsyncpa [#allocation4], 1 }
  0xa4   :  { %128 = vsyncpa [#allocation7], 1 }
  0xa5   :  { %129 = vsyncpa [#allocation5], 1 }

</bundles_post_ra>
